<compile_context>
chip_gen: v5e
topology: v5e:2x2
jax: 0.10.0
libtpu: 0.0.40
codegen_flags: <defaults>
</compile_context>

<pallas_src>
import math
import functools

import jax
import jax.numpy as jnp
from jax.experimental import pallas as pl
from jax.experimental.pallas import tpu as pltpu


def _token_select_kernel(x_ref, w_ref, b_ref, u_ref, sel_ref, logit_ref,
                         *, L, tau, thr_logit, is_hard, training):
    # x_ref: (TM, D)   w_ref: (1, D) f32   b_ref: (1, 1) f32
    # u_ref: (TM, 1) uniforms (training) or (1, 1) dummy (eval)
    # sel_ref / logit_ref: (TM, 1)
    x = x_ref[...].astype(jnp.float32)                    # upcast in VMEM
    w = w_ref[...]                                        # (1, D), broadcasts

    # VPU multiply + XLU lane-reduce; avoids a 1-column MXU matvec.
    logits = jnp.sum(x * w, axis=-1, keepdims=True) + b_ref[0, 0]   # (TM, 1) f32
    logit_ref[...] = logits.astype(logit_ref.dtype)

    if training:
        # Logistic(0,1) == Gumbel - Gumbel, from a single uniform.
        u = u_ref[...]
        noise = jnp.log(u) - jnp.log1p(-u)
        z = (logits + noise) * (1.0 / tau)
    else:
        z = logits

    if is_hard:
        # Forward value of the straight-through estimator is the hard mask;
        # sigmoid(z) > threshold  <=>  z > logit(threshold).
        sel = (z > thr_logit).astype(jnp.float32)
    else:
        sel = jax.nn.sigmoid(z)

    # CLS token (global row index == 0 mod L) is always selected.
    tm = sel_ref.shape[0]
    rows = jax.lax.broadcasted_iota(jnp.int32, (tm, 1), 0) + pl.program_id(0) * tm
    sel = jnp.where(rows % L == 0, 1.0, sel)
    sel_ref[...] = sel.astype(sel_ref.dtype)


def token_select_forward(x, w, b, *, tau=5.0, threshold=0.5, is_hard=True,
                         training=False, rng=None, block_m=512):
    """x: (B, L, D); w: (D, N); b: (N,) with N == 1.

    Returns (token_select (B, L, 1), logits (B, L-1, 1)), matching the
    PyTorch TokenSelect.forward.
    """
    B, L, D = x.shape
    N = w.shape[-1]
    # torch.cat([ones(b,1,1), token_select], dim=1) only type-checks for N == 1.
    assert N == 1, "TokenSelect requires num_sub_layer == 1"
    assert 0.0 < threshold < 1.0

    M = B * L
    xf = x.reshape(M, D)                                   # free, no HBM copy
    w_row = w.reshape(1, D).astype(jnp.float32)            # tiny
    b_sc = b.reshape(1, 1).astype(jnp.float32)

    # Large flattened row tiles (cap 512: fits v5e 16 MiB scoped default and
    # v7x 64 MiB VMEM with plenty of headroom, and is big enough for the HBM
    # roofline).  TM = M when the whole thing fits in one tile.
    TM = M if M <= block_m else block_m
    grid = (pl.cdiv(M, TM),)

    if training:
        if rng is None:
            rng = jax.random.PRNGKey(0)
        eps = 1e-6
        u = jax.random.uniform(rng, (M, 1), dtype=jnp.float32,
                               minval=eps, maxval=1.0 - eps)
        u_spec = pl.BlockSpec((TM, 1), lambda i: (i, 0))
    else:
        u = jnp.zeros((1, 1), jnp.float32)                 # unused placeholder
        u_spec = pl.BlockSpec((1, 1), lambda i: (0, 0))

    thr_logit = float(math.log(threshold / (1.0 - threshold)))

    kernel = functools.partial(
        _token_select_kernel, L=L, tau=float(tau), thr_logit=thr_logit,
        is_hard=bool(is_hard), training=bool(training))

    sel, logits = pl.pallas_call(
        kernel,
        out_shape=(jax.ShapeDtypeStruct((M, 1), x.dtype),
                   jax.ShapeDtypeStruct((M, 1), x.dtype)),
        grid=grid,
        in_specs=[pl.BlockSpec((TM, D), lambda i: (i, 0)),
                  pl.BlockSpec((1, D),  lambda i: (0, 0)),
                  pl.BlockSpec((1, 1),  lambda i: (0, 0)),
                  u_spec],
        out_specs=[pl.BlockSpec((TM, 1), lambda i: (i, 0)),
                   pl.BlockSpec((TM, 1), lambda i: (i, 0))],
        compiler_params=pltpu.CompilerParams(
            dimension_semantics=("parallel",)),
    )(xf, w_row, b_sc, u)

    token_select = sel.reshape(B, L, 1)
    logits_out = logits.reshape(B, L, 1)[:, 1:, :]         # tiny slice
    return token_select, logits_out


if __name__ == "__main__":
    key = jax.random.PRNGKey(0)
    kx, kw, kb = jax.random.split(key, 3)

    B, L, D, N = 2, 8, 32, 1   # batch=2, seq=8 (1 CLS + 7 tokens), dim_in=32
    x = jax.random.normal(kx, (B, L, D), dtype=jnp.float32)

    # deterministic nn.Linear-style init (uniform with fan-in bound)
    bound = 1.0 / math.sqrt(D)
    w = jax.random.uniform(kw, (D, N), minval=-bound, maxval=bound, dtype=jnp.float32)
    b = jax.random.uniform(kb, (N,),   minval=-bound, maxval=bound, dtype=jnp.float32)

    # --- eval mode (deterministic): check against pure-JAX reference ---
    sel_eval, logits_eval = token_select_forward(
        x, w, b, tau=5.0, threshold=0.5, is_hard=True, training=False)
    jax.block_until_ready((sel_eval, logits_eval))

    ref_logits = x[:, 1:, :] @ w + b
    assert sel_eval.shape == (B, L, 1)
    assert logits_eval.shape == (B, L - 1, 1)
    assert jnp.allclose(logits_eval, ref_logits, atol=1e-5, rtol=1e-5)
    exp_body = (jax.nn.sigmoid(logits_eval) > 0.5).astype(sel_eval.dtype)
    assert jnp.array_equal(sel_eval[:, 1:, :], exp_body)
    assert jnp.all(sel_eval[:, 0, :] == 1.0)

    # --- training mode (logistic ≡ gumbel-difference noise) ---
    sel_tr, logits_tr = token_select_forward(
        x, w, b, tau=5.0, threshold=0.5, is_hard=True, training=True,
        rng=jax.random.PRNGKey(42))
    jax.block_until_ready((sel_tr, logits_tr))
    assert sel_tr.shape == (B, L, 1)
    assert logits_tr.shape == (B, L - 1, 1)
    # logits are noise-free in both modes
    assert jnp.allclose(logits_tr, ref_logits, atol=1e-5, rtol=1e-5)
    # hard selection is binary, CLS row forced to 1
    assert jnp.all((sel_tr == 0.0) | (sel_tr == 1.0))
    assert jnp.all(sel_tr[:, 0, :] == 1.0)

    print("KERNEL_OK")
</pallas_src>

<mosaic_0001>
module attributes {stable_mosaic.version = 11 : i64} {
  func.func @_token_select_kernel(%arg0: i32, %arg1: memref<16x32xf32, #tpu.memory_space<vmem>>, %arg2: memref<1x32xf32, #tpu.memory_space<vmem>>, %arg3: memref<1x1xf32, #tpu.memory_space<vmem>>, %arg4: memref<1x1xf32, #tpu.memory_space<vmem>>, %arg5: memref<16x1xf32, #tpu.memory_space<vmem>>, %arg6: memref<16x1xf32, #tpu.memory_space<vmem>>) attributes {dimension_semantics = [#tpu.dimension_semantics<parallel>], iteration_bounds = array<i64: 1>, scalar_prefetch = 0 : i64, scratch_operands = 0 : i64, tpu.core_type = #tpu.core_type<tc>, window_params = [{transform_indices = @transform_0, window_bounds = array<i64: 16, 32>}, {pipeline_mode = #tpu.pipeline_mode<synchronous>, transform_indices = @transform_1, window_bounds = array<i64: 1, 32>}, {pipeline_mode = #tpu.pipeline_mode<synchronous>, transform_indices = @transform_2, window_bounds = array<i64: 1, 1>}, {pipeline_mode = #tpu.pipeline_mode<synchronous>, transform_indices = @transform_3, window_bounds = array<i64: 1, 1>}, {transform_indices = @transform_4, window_bounds = array<i64: 16, 1>}, {transform_indices = @transform_5, window_bounds = array<i64: 16, 1>}]} {
    %c0 = arith.constant 0 : index
    %c0_0 = arith.constant 0 : index
    %0 = vector.load %arg1[%c0, %c0_0] : memref<16x32xf32, #tpu.memory_space<vmem>>, vector<16x32xf32>
    %c0_1 = arith.constant 0 : index
    %c0_2 = arith.constant 0 : index
    %1 = vector.load %arg2[%c0_1, %c0_2] : memref<1x32xf32, #tpu.memory_space<vmem>>, vector<1x32xf32>
    %2 = vector.broadcast %1 : vector<1x32xf32> to vector<16x32xf32>
    %3 = arith.mulf %0, %2 : vector<16x32xf32>
    %cst = arith.constant dense<0.000000e+00> : vector<16xf32>
    %4 = vector.multi_reduction <add>, %3, %cst [1] : vector<16x32xf32> to vector<16xf32>
    %5 = vector.shape_cast %4 : vector<16xf32> to vector<16x1xf32>
    %c0_3 = arith.constant 0 : index
    %c0_4 = arith.constant 0 : index
    %6 = vector.load %arg3[%c0_3, %c0_4] : memref<1x1xf32, #tpu.memory_space<vmem>>, vector<1x1xf32>
    %7 = vector.extract %6[0, 0] : f32 from vector<1x1xf32>
    %8 = vector.broadcast %7 : f32 to vector<16x1xf32>
    %9 = arith.addf %5, %8 : vector<16x1xf32>
    %c0_5 = arith.constant 0 : index
    %c0_6 = arith.constant 0 : index
    %10 = vector.load %arg6[%c0_5, %c0_6] : memref<16x1xf32, #tpu.memory_space<vmem>>, vector<16x1xf32>
    tpu.vector_store %arg6[%c0_5, %c0_6], %9 {strides = array<i32>} : memref<16x1xf32, #tpu.memory_space<vmem>>, vector<16x1xf32>,
    %cst_7 = arith.constant 0.000000e+00 : f32
    %11 = vector.broadcast %cst_7 : f32 to vector<16x1xf32>
    %12 = arith.cmpf ogt, %9, %11 : vector<16x1xf32>
    %13 = arith.extui %12 : vector<16x1xi1> to vector<16x1xi32>
    %14 = arith.sitofp %13 : vector<16x1xi32> to vector<16x1xf32>
    %15 = tpu.iota {dimensions = array<i32: 0>} : vector<16x1xi32>
    %c16_i32 = arith.constant 16 : i32
    %16 = arith.muli %arg0, %c16_i32 : i32
    %17 = vector.broadcast %16 : i32 to vector<16x1xi32>
    %18 = arith.addi %15, %17 : vector<16x1xi32>
    %c8_i32 = arith.constant 8 : i32
    %c0_i32 = arith.constant 0 : i32
    %19 = arith.cmpi eq, %c8_i32, %c0_i32 : i32
    %c1_i32 = arith.constant 1 : i32
    %20 = arith.select %19, %c1_i32, %c8_i32 : i32
    %21 = vector.broadcast %20 : i32 to vector<16x1xi32>
    %22 = arith.remsi %18, %21 : vector<16x1xi32>
    %c0_i32_8 = arith.constant 0 : i32
    %23 = vector.broadcast %c0_i32_8 : i32 to vector<16x1xi32>
    %24 = arith.cmpi ne, %22, %23 : vector<16x1xi32>
    %c0_i32_9 = arith.constant 0 : i32
    %25 = vector.broadcast %c0_i32_9 : i32 to vector<16x1xi32>
    %26 = arith.cmpi slt, %22, %25 : vector<16x1xi32>
    %c0_i32_10 = arith.constant 0 : i32
    %27 = arith.cmpi slt, %20, %c0_i32_10 : i32
    %28 = vector.broadcast %27 : i1 to vector<16x1xi1>
    %29 = vector.broadcast %28 : vector<16x1xi1> to vector<16x1xi1>
    %30 = arith.xori %26, %29 : vector<16x1xi1>
    %31 = arith.andi %30, %24 : vector<16x1xi1>
    %32 = vector.broadcast %20 : i32 to vector<16x1xi32>
    %33 = arith.addi %22, %32 : vector<16x1xi32>
    %34 = arith.select %31, %33, %22 : vector<16x1xi1>, vector<16x1xi32>
    %c0_i32_11 = arith.constant 0 : i32
    %35 = vector.broadcast %c0_i32_11 : i32 to vector<16x1xi32>
    %36 = arith.cmpi eq, %34, %35 : vector<16x1xi32>
    %cst_12 = arith.constant 1.000000e+00 : f32
    %37 = vector.broadcast %cst_12 : f32 to vector<16x1xf32>
    %38 = arith.select %36, %37, %14 : vector<16x1xi1>, vector<16x1xf32>
    %c0_13 = arith.constant 0 : index
    %c0_14 = arith.constant 0 : index
    %39 = vector.load %arg5[%c0_13, %c0_14] : memref<16x1xf32, #tpu.memory_space<vmem>>, vector<16x1xf32>
    tpu.vector_store %arg5[%c0_13, %c0_14], %38 {strides = array<i32>} : memref<16x1xf32, #tpu.memory_space<vmem>>, vector<16x1xf32>,
    return
  }
  func.func @transform_0(%arg0: i32) -> (i32, i32) {
    %c0_i32 = arith.constant 0 : i32
    %c0_i32_0 = arith.constant 0 : i32
    return %arg0, %c0_i32 : i32, i32
  }
  func.func @transform_1(%arg0: i32) -> (i32, i32) {
    %c0_i32 = arith.constant 0 : i32
    %c0_i32_0 = arith.constant 0 : i32
    %c0_i32_1 = arith.constant 0 : i32
    return %c0_i32, %c0_i32_0 : i32, i32
  }
  func.func @transform_2(%arg0: i32) -> (i32, i32) {
    %c0_i32 = arith.constant 0 : i32
    %c0_i32_0 = arith.constant 0 : i32
    %c0_i32_1 = arith.constant 0 : i32
    return %c0_i32, %c0_i32_0 : i32, i32
  }
  func.func @transform_3(%arg0: i32) -> (i32, i32) {
    %c0_i32 = arith.constant 0 : i32
    %c0_i32_0 = arith.constant 0 : i32
    %c0_i32_1 = arith.constant 0 : i32
    return %c0_i32, %c0_i32_0 : i32, i32
  }
  func.func @transform_4(%arg0: i32) -> (i32, i32) {
    %c0_i32 = arith.constant 0 : i32
    %c0_i32_0 = arith.constant 0 : i32
    return %arg0, %c0_i32 : i32, i32
  }
  func.func @transform_5(%arg0: i32) -> (i32, i32) {
    %c0_i32 = arith.constant 0 : i32
    %c0_i32_0 = arith.constant 0 : i32
    return %arg0, %c0_i32 : i32, i32
  }
}

</mosaic_0001>

<bundles_post_ra>
// kernel: tpu_custom_call.1
= control target key start
LH: loop header
LB: loop body
LE: loop exit
PB: predicated region body
PF: predicated region fallthrough
CT: control target
= control target key end

     0   :  { %s208_s0 = inlined_call_operand.hbm [shape: f32[16,32], index: 0, kind: input, shape index: {}]   ;;  %s209_s1 = inlined_call_operand.vmem [shape: f32[1,32], index: 1, kind: input, shape index: {}]   ;;  %s210_s2 = inlined_call_operand.<no memory space> [shape: f32[1,1], index: 2, kind: input, shape index: {}]   ;;  %s211_s4 = inlined_call_operand.vmem [shape: f32[16,1], index: 4, kind: output, shape index: {0}]   ;;  %s212_s5 = inlined_call_operand.vmem [shape: f32[16,1], index: 5, kind: output, shape index: {1}]   ;;  %s213_s3 = inlined_call_operand.<no memory space> [shape: f32[1,1], index: 3, kind: input, shape index: {}]  }
   0x1   :  { %v11_v0 = vstv %s210_s2 }
   0x2   :  { %12 = vst [vmem:[#allocation2] sm:$0x1] %v11_v0 }
   0x3   :  { %15 = vsyncpa [#allocation5], 0  ;;  %s20_s22 = sshll.u32 %s208_s0, 4  ;;  %s149_s23 = smov [#allocation4]   ;;  %s21_s22 = int_to_ptr.hbm [resolvable:$true] %s20_s22 }
   0x4   :  { %s22_s24 = sshll.u32 %s149_s23, 4  ;;  %s150_s25 = smov 128   ;;  %s23_s24 = int_to_ptr.vmem [resolvable:$true] %s22_s24 }
   0x5   :  { %s151_s26 = smov 8  }
   0x6   :  { %28 = dma.hbm_to_vmem [thread:$0]  %s21_s22, 256, %s23_s24, [#allocation5], %s150_s25, %s150_s25, %s151_s26  }
   0x7   :  { %147 = dma.done.wait [#allocation5], 256  }
   0x8   :  { %148 = vsyncadd [#allocation5], 4294967040  ;;  %v39_v1 = vld [vmem:[#allocation4] sm:$0xff]  ;;  %v122_v2 = vld [vmem:[%s209_s1] ss:$0 sm:$0xff]  ;;  %vm47_vm0 = vcmask 261120   ;;  %v68_v9 = vlaneseq }
   0x9   :  { %v54_v3 = vld [vmem:[#allocation2] sm:$0x1]  ;;  %v45_v4 = vmul.f32 %v122_v2, %v39_v1  ;;  %v40_v5 = vld [vmem:[#allocation4 + $0x8] sm:$0xff]  ;;  %vm59_vm1 = vcmask 7168   ;;  %v152_v16 = vmov 0.0  }
   0xa   :  { %116 = vpush %v54_v3  ;;  %v46_v7 = vmul.f32 %v122_v2, %v40_v5  ;;  %v69_v10 = vshrl.u32 %v68_v9, 7 }
   0xb   :  { %v48_v6 = vsel %vm47_vm0, %v45_v4, 0.0 }
   0xc   :  { %49 = vadd.xlane.f32.xlu0 %v48_v6  ;;  %v51_v8 = vsel %vm47_vm0, %v46_v7, 0.0  ;;  %v79_v12 = vand.u32 7, %v69_v10  ;;  %v70_v15 = vadd.s32 8, %v69_v10 }
   0xe   :  { %vm99_vm2 = vcmp.eq.s32.totalorder %v79_v12, 0  ;;  %v86_v19 = vand.u32 7, %v70_v15 }
  0x10   :  { %vm100_vm4 = vcmp.eq.s32.totalorder %v86_v19, 0 }
  0x14   :  { %52 = vadd.xlane.f32.xlu0 %v51_v8 }
  0x3b   :  { %s117_s0 = spop %116 }
  0x3c   :  { %v56_v11 = vstv %s117_s0 }
  0x7f   :  { %v50_v13 = vpop.xlane.xlu0 %49 }
  0x80   :  { %v57_v14 = vadd.f32 %v56_v11, %v50_v13 }
  0x82   :  { %60 = vst.msk [vmem:[%s212_s5] sm:$0xff] %vm59_vm1, %v57_v14  ;;  %vm62_vm3 = vcmp.gt.f32.partialorder %v57_v14, 0.0 }
  0x83   :  { %v114_v17 = vsel %vm62_vm3, 1.0, %v152_v16 }
  0x84   :  { %v101_v18 = vsel %vm99_vm2, 1.0, %v114_v17 }
  0x85   :  { %103 = vst.msk [vmem:[%s211_s4] sm:$0xff] %vm59_vm1, %v101_v18 }
  0x87   :  { %v53_v20 = vpop.xlane.xlu0 %52 }
  0x88   :  { %v58_v21 = vadd.f32 %v56_v11, %v53_v20 }
  0x8a   :  { %61 = vst.msk [vmem:[%s212_s5 + $0x8] sm:$0xff] %vm59_vm1, %v58_v21  ;;  %vm63_vm5 = vcmp.gt.f32.partialorder %v58_v21, 0.0 }
  0x8b   :  { %v115_v22 = vsel %vm63_vm5, 1.0, %v152_v16 }
  0x8c   :  { %v102_v23 = vsel %vm100_vm4, 1.0, %v115_v22 }
  0x8d   :  { %104 = vst.msk [vmem:[%s211_s4 + $0x8] sm:$0xff] %vm59_vm1, %v102_v23 }
  0x8e   :  { %113 = vsyncpa [#allocation5], 1 }

</bundles_post_ra>
